<compile_context>
chip_gen: v6e
topology: v6e:2x2x1
jax: 0.10.0
libtpu: 0.0.40
codegen_flags: <defaults>
</compile_context>

<pallas_src>
import jax
import jax.numpy as jnp
from jax.experimental import pallas as pl
from jax.experimental.pallas import tpu as pltpu


def _round_up(n, m):
    return ((n + m - 1) // m) * m


def dqn_kernel(x_ref, w1_ref, b1_ref, w2_ref, b2_ref, w3_ref, b3_ref, o_ref):
    # x arrives f32; cast to bf16 on the VPU (hidden under DMA/matmul) instead of
    # paying a separate wrapper-side cast pass over x in HBM.
    x = x_ref[...].astype(jnp.bfloat16)

    # fc1 + ReLU  (bf16 operands, f32 accumulate, f32 epilogue)
    h1 = jnp.dot(x, w1_ref[...], preferred_element_type=jnp.float32)
    h1 = jnp.maximum(h1 + b1_ref[...], 0.0)

    # fc2 + ReLU
    h2 = jnp.dot(h1.astype(jnp.bfloat16), w2_ref[...],
                 preferred_element_type=jnp.float32)
    h2 = jnp.maximum(h2 + b2_ref[...], 0.0)

    # fc3: lane-dense padded matmul (w3 padded to 128 cols with zeros), but only
    # the real out_dim columns are biased and stored to HBM.
    out = jnp.dot(h2.astype(jnp.bfloat16), w3_ref[...],
                  preferred_element_type=jnp.float32)
    out_dim = o_ref.shape[-1]
    o_ref[...] = out[:, :out_dim] + b3_ref[...]


def dqn_forward(x, params, *, batch_tile=1024):
    """x: (B, input_dim) float32; params: dict of w1,b1,w2,b2,w3,b3 (f32)."""
    w1, b1, w2, b2, w3, b3 = (params["w1"], params["b1"], params["w2"],
                              params["b2"], params["w3"], params["b3"])
    B, in_dim = x.shape
    hidden = w1.shape[1]
    out_dim = w3.shape[1]

    # --- batch tiling ---------------------------------------------------------
    # Multiple of 16 (bf16 sublane packing), large by default: per-step pipeline
    # overhead dominates the tiny per-tile compute, so fewer/bigger steps win.
    tb = min(batch_tile, _round_up(B, 16))
    B_pad = _round_up(B, tb)
    # v7x megacore: keep >=2 grid steps for large batches so the "parallel" axis
    # actually shards across both TensorCores.
    if B_pad // tb == 1 and tb >= 32:
        tb //= 2
        B_pad = _round_up(B, tb)
    grid = (B_pad // tb,)

    # --- operand prep (wrapper-side, no cast pass over x) ----------------------
    n_pad = _round_up(out_dim, 128)  # lane-dense fc3 matmul width
    x_p = x if B_pad == B else jnp.pad(x, ((0, B_pad - B), (0, 0)))  # stays f32
    w1_c = w1.astype(jnp.bfloat16)
    w2_c = w2.astype(jnp.bfloat16)
    w3_c = jnp.pad(w3, ((0, 0), (0, n_pad - out_dim))).astype(jnp.bfloat16)
    b1_c = b1.astype(jnp.float32)
    b2_c = b2.astype(jnp.float32)
    b3_c = b3.astype(jnp.float32)  # unpadded; added after slicing the matmul

    # Resident (constant-index) blocks for weights/biases: fetched once, stay in VMEM.
    def resident(a):
        return pl.BlockSpec(a.shape, lambda i: (0,) * a.ndim)

    flops = 2 * B_pad * (in_dim * hidden + hidden * hidden + hidden * n_pad)
    bytes_accessed = (x_p.size * 4                                   # x read once (f32)
                      + w1_c.size * 2 + w2_c.size * 2 + w3_c.size * 2  # weights once (bf16)
                      + b1_c.size * 4 + b2_c.size * 4 + b3_c.size * 4
                      + B_pad * out_dim * 4)                         # narrow f32 output

    compiler_kwargs = dict(dimension_semantics=("parallel",))
    if tb >= 2048:
        # v5e's scoped-VMEM default (16 MiB) is the binding one for huge tiles.
        compiler_kwargs["vmem_limit_bytes"] = 64 * 1024 * 1024

    out = pl.pallas_call(
        dqn_kernel,
        out_shape=jax.ShapeDtypeStruct((B_pad, out_dim), jnp.float32),
        grid_spec=pl.GridSpec(
            grid=grid,
            in_specs=[
                pl.BlockSpec((tb, in_dim), lambda i: (i, 0)),   # x: batch-tiled, f32
                resident(w1_c), resident(b1_c),
                resident(w2_c), resident(b2_c),
                resident(w3_c), resident(b3_c),
            ],
            out_specs=pl.BlockSpec((tb, out_dim), lambda i: (i, 0)),  # narrow store
        ),
        compiler_params=pltpu.CompilerParams(**compiler_kwargs),
        cost_estimate=pl.CostEstimate(
            flops=flops, transcendentals=0, bytes_accessed=bytes_accessed),
    )(x_p, w1_c, b1_c, w2_c, b2_c, w3_c, b3_c)

    # Strip batch padding only (no column padding was written).
    return out[:B] if B_pad != B else out


def init_dqn_params(key, input_dim, output_dim, hidden=128):
    """Deterministic init mimicking PyTorch nn.Linear default (U(-k, k), k=1/sqrt(fan_in))."""
    keys = jax.random.split(key, 6)

    def linear(kw, kb, fan_in, fan_out):
        bound = 1.0 / jnp.sqrt(jnp.float32(fan_in))
        w = jax.random.uniform(kw, (fan_in, fan_out), jnp.float32, -bound, bound)
        b = jax.random.uniform(kb, (1, fan_out), jnp.float32, -bound, bound)
        return w, b

    w1, b1 = linear(keys[0], keys[1], input_dim, hidden)
    w2, b2 = linear(keys[2], keys[3], hidden, hidden)
    w3, b3 = linear(keys[4], keys[5], hidden, output_dim)
    return {"w1": w1, "b1": b1, "w2": w2, "b2": b2, "w3": w3, "b3": b3}


def dqn_reference(x, p):
    h1 = jnp.maximum(x @ p["w1"] + p["b1"], 0.0)
    h2 = jnp.maximum(h1 @ p["w2"] + p["b2"], 0.0)
    return h2 @ p["w3"] + p["b3"]


if __name__ == "__main__":
    key = jax.random.PRNGKey(0)
    kx, kp = jax.random.split(key)

    batch, input_dim, output_dim = 2, 8, 4
    x = jax.random.normal(kx, (batch, input_dim), jnp.float32)
    params = init_dqn_params(kp, input_dim, output_dim)

    out = dqn_forward(x, params)
    out = jax.block_until_ready(out)

    ref = dqn_reference(x, params)
    assert out.shape == (batch, output_dim)
    # bf16 matmul operands with f32 accumulation -> loosened tolerance vs f32 ref.
    assert jnp.allclose(out, ref, atol=5e-2, rtol=5e-2), "mismatch vs reference"

    print("KERNEL_OK")
</pallas_src>

<mosaic_0001>
module attributes {stable_mosaic.version = 11 : i64} {
  func.func @dqn_kernel(%arg0: i32, %arg1: memref<16x8xf32, #tpu.memory_space<vmem>>, %arg2: memref<8x128xbf16, #tpu.memory_space<vmem>>, %arg3: memref<1x128xf32, #tpu.memory_space<vmem>>, %arg4: memref<128x128xbf16, #tpu.memory_space<vmem>>, %arg5: memref<1x128xf32, #tpu.memory_space<vmem>>, %arg6: memref<128x128xbf16, #tpu.memory_space<vmem>>, %arg7: memref<1x4xf32, #tpu.memory_space<vmem>>, %arg8: memref<16x4xf32, #tpu.memory_space<vmem>>) attributes {dimension_semantics = [#tpu.dimension_semantics<parallel>], iteration_bounds = array<i64: 1>, scalar_prefetch = 0 : i64, scratch_operands = 0 : i64, tpu.core_type = #tpu.core_type<tc>, window_params = [{transform_indices = @transform_0, window_bounds = array<i64: 16, 8>}, {pipeline_mode = #tpu.pipeline_mode<synchronous>, transform_indices = @transform_1, window_bounds = array<i64: 8, 128>}, {pipeline_mode = #tpu.pipeline_mode<synchronous>, transform_indices = @transform_2, window_bounds = array<i64: 1, 128>}, {pipeline_mode = #tpu.pipeline_mode<synchronous>, transform_indices = @transform_3, window_bounds = array<i64: 128, 128>}, {pipeline_mode = #tpu.pipeline_mode<synchronous>, transform_indices = @transform_4, window_bounds = array<i64: 1, 128>}, {pipeline_mode = #tpu.pipeline_mode<synchronous>, transform_indices = @transform_5, window_bounds = array<i64: 128, 128>}, {pipeline_mode = #tpu.pipeline_mode<synchronous>, transform_indices = @transform_6, window_bounds = array<i64: 1, 4>}, {transform_indices = @transform_7, window_bounds = array<i64: 16, 4>}]} {
    %c0 = arith.constant 0 : index
    %c0_0 = arith.constant 0 : index
    %0 = vector.load %arg1[%c0, %c0_0] : memref<16x8xf32, #tpu.memory_space<vmem>>, vector<16x8xf32>
    %1 = arith.truncf %0 : vector<16x8xf32> to vector<16x8xbf16>
    %c0_1 = arith.constant 0 : index
    %c0_2 = arith.constant 0 : index
    %2 = vector.load %arg2[%c0_1, %c0_2] : memref<8x128xbf16, #tpu.memory_space<vmem>>, vector<8x128xbf16>
    %cst = arith.constant dense<0.000000e+00> : vector<16x128xf32>
    %3 = tpu.matmul %1, %2, %cst {dimension_numbers = #tpu.dot_dimension_numbers<[1], [0], [0], [1], [0, 0, 1, 1], [], []>} : vector<16x8xbf16>, vector<8x128xbf16>, vector<16x128xf32> -> vector<16x128xf32>
    %c0_3 = arith.constant 0 : index
    %c0_4 = arith.constant 0 : index
    %4 = vector.load %arg3[%c0_3, %c0_4] : memref<1x128xf32, #tpu.memory_space<vmem>>, vector<1x128xf32>
    %5 = vector.broadcast %4 : vector<1x128xf32> to vector<16x128xf32>
    %6 = arith.addf %3, %5 : vector<16x128xf32>
    %cst_5 = arith.constant 0.000000e+00 : f32
    %7 = vector.broadcast %cst_5 : f32 to vector<16x128xf32>
    %8 = arith.maximumf %6, %7 : vector<16x128xf32>
    %9 = arith.truncf %8 : vector<16x128xf32> to vector<16x128xbf16>
    %c0_6 = arith.constant 0 : index
    %c0_7 = arith.constant 0 : index
    %10 = vector.load %arg4[%c0_6, %c0_7] : memref<128x128xbf16, #tpu.memory_space<vmem>>, vector<128x128xbf16>
    %cst_8 = arith.constant dense<0.000000e+00> : vector<16x128xf32>
    %11 = tpu.matmul %9, %10, %cst_8 {dimension_numbers = #tpu.dot_dimension_numbers<[1], [0], [0], [1], [0, 0, 1, 1], [], []>} : vector<16x128xbf16>, vector<128x128xbf16>, vector<16x128xf32> -> vector<16x128xf32>
    %c0_9 = arith.constant 0 : index
    %c0_10 = arith.constant 0 : index
    %12 = vector.load %arg5[%c0_9, %c0_10] : memref<1x128xf32, #tpu.memory_space<vmem>>, vector<1x128xf32>
    %13 = vector.broadcast %12 : vector<1x128xf32> to vector<16x128xf32>
    %14 = arith.addf %11, %13 : vector<16x128xf32>
    %cst_11 = arith.constant 0.000000e+00 : f32
    %15 = vector.broadcast %cst_11 : f32 to vector<16x128xf32>
    %16 = arith.maximumf %14, %15 : vector<16x128xf32>
    %17 = arith.truncf %16 : vector<16x128xf32> to vector<16x128xbf16>
    %c0_12 = arith.constant 0 : index
    %c0_13 = arith.constant 0 : index
    %18 = vector.load %arg6[%c0_12, %c0_13] : memref<128x128xbf16, #tpu.memory_space<vmem>>, vector<128x128xbf16>
    %cst_14 = arith.constant dense<0.000000e+00> : vector<16x128xf32>
    %19 = tpu.matmul %17, %18, %cst_14 {dimension_numbers = #tpu.dot_dimension_numbers<[1], [0], [0], [1], [0, 0, 1, 1], [], []>} : vector<16x128xbf16>, vector<128x128xbf16>, vector<16x128xf32> -> vector<16x128xf32>
    %20 = vector.extract_strided_slice %19 {offsets = [0, 0], sizes = [16, 4], strides = [1, 1]} : vector<16x128xf32> to vector<16x4xf32>
    %c0_15 = arith.constant 0 : index
    %c0_16 = arith.constant 0 : index
    %21 = vector.load %arg7[%c0_15, %c0_16] : memref<1x4xf32, #tpu.memory_space<vmem>>, vector<1x4xf32>
    %22 = vector.broadcast %21 : vector<1x4xf32> to vector<16x4xf32>
    %23 = arith.addf %20, %22 : vector<16x4xf32>
    %c0_17 = arith.constant 0 : index
    %c0_18 = arith.constant 0 : index
    %24 = vector.load %arg8[%c0_17, %c0_18] : memref<16x4xf32, #tpu.memory_space<vmem>>, vector<16x4xf32>
    tpu.vector_store %arg8[%c0_17, %c0_18], %23 {strides = array<i32>} : memref<16x4xf32, #tpu.memory_space<vmem>>, vector<16x4xf32>,
    return
  }
  func.func @transform_0(%arg0: i32) -> (i32, i32) {
    %c0_i32 = arith.constant 0 : i32
    %c0_i32_0 = arith.constant 0 : i32
    return %arg0, %c0_i32 : i32, i32
  }
  func.func @transform_1(%arg0: i32) -> (i32, i32) {
    %c0_i32 = arith.constant 0 : i32
    %c0_i32_0 = arith.constant 0 : i32
    %c0_i32_1 = arith.constant 0 : i32
    return %c0_i32, %c0_i32_0 : i32, i32
  }
  func.func @transform_2(%arg0: i32) -> (i32, i32) {
    %c0_i32 = arith.constant 0 : i32
    %c0_i32_0 = arith.constant 0 : i32
    %c0_i32_1 = arith.constant 0 : i32
    return %c0_i32, %c0_i32_0 : i32, i32
  }
  func.func @transform_3(%arg0: i32) -> (i32, i32) {
    %c0_i32 = arith.constant 0 : i32
    %c0_i32_0 = arith.constant 0 : i32
    %c0_i32_1 = arith.constant 0 : i32
    return %c0_i32, %c0_i32_0 : i32, i32
  }
  func.func @transform_4(%arg0: i32) -> (i32, i32) {
    %c0_i32 = arith.constant 0 : i32
    %c0_i32_0 = arith.constant 0 : i32
    %c0_i32_1 = arith.constant 0 : i32
    return %c0_i32, %c0_i32_0 : i32, i32
  }
  func.func @transform_5(%arg0: i32) -> (i32, i32) {
    %c0_i32 = arith.constant 0 : i32
    %c0_i32_0 = arith.constant 0 : i32
    %c0_i32_1 = arith.constant 0 : i32
    return %c0_i32, %c0_i32_0 : i32, i32
  }
  func.func @transform_6(%arg0: i32) -> (i32, i32) {
    %c0_i32 = arith.constant 0 : i32
    %c0_i32_0 = arith.constant 0 : i32
    %c0_i32_1 = arith.constant 0 : i32
    return %c0_i32, %c0_i32_0 : i32, i32
  }
  func.func @transform_7(%arg0: i32) -> (i32, i32) {
    %c0_i32 = arith.constant 0 : i32
    %c0_i32_0 = arith.constant 0 : i32
    return %arg0, %c0_i32 : i32, i32
  }
}

</mosaic_0001>

<bundles_post_ra>
// kernel: tpu_custom_call.1
= control target key start
LH: loop header
LB: loop body
LE: loop exit
PB: predicated region body
PF: predicated region fallthrough
CT: control target
= control target key end

     0   :  { %12 = vsyncpa [#allocation3], 0  ;;  %s607_s0 = inlined_call_operand.vmem [shape: f32[16,8], index: 0, kind: input, shape index: {}]   ;;  %s608_s1 = inlined_call_operand.vmem [shape: bf16[8,128], index: 1, kind: input, shape index: {}]   ;;  %s609_s2 = inlined_call_operand.vmem [shape: f32[1,128], index: 2, kind: input, shape index: {}]   ;;  %s610_s3 = inlined_call_operand.hbm [shape: bf16[128,128], index: 3, kind: input, shape index: {}]   ;;  %s611_s4 = inlined_call_operand.vmem [shape: f32[1,128], index: 4, kind: input, shape index: {}]   ;;  %s612_s5 = inlined_call_operand.hbm [shape: bf16[128,128], index: 5, kind: input, shape index: {}]   ;;  %s613_s6 = inlined_call_operand.vmem [shape: f32[1,4], index: 6, kind: input, shape index: {}]   ;;  %s614_s7 = inlined_call_operand.vmem [shape: f32[16,4], index: 7, kind: output, shape index: {}]  }
   0x1   :  { %13 = vsyncpa [#allocation5], 0  ;;  %s508_s24 = smov [#allocation2]  }
   0x2   :  { %s25_s25 = sshll.u32 %s508_s24, 4  ;;  %s26_s25 = int_to_ptr.vmem [resolvable:$true] %s25_s25 }
   0x3   :  { %s472_s26 = scalar_lea.vmem %s26_s25, 1024  ;;  %p477_p1 = scmp.lt.s32.totalorder %s26_s25, %s26_s25 }
   0x4   :  { %p473_p0 = scmp.ne.s32.totalorder %s26_s25, %s472_s26  ;;  %p478_p2 = scmp.lt.s32.totalorder %s472_s26, %s472_s26 }
   0x6   :  { %p479_p3 = por %p478_p2, %p477_p1 }
   0x8   :  { %p480_p4 = pnand %p479_p3, %p473_p0 }
   0xa   :  { %483 = shalt.err (!%p480_p4)
}
   0xb   :  { %s509_s27 = smov 64   ;;  %s510_s28 = smov 4  }
   0xc   :  { %31 = dma.hbm_to_vmem [thread:$0]  %s610_s3, 1024, %s26_s25, [#allocation3], %s509_s27, %s509_s27, %s510_s28  }
   0xd   :  { %s511_s8 = smov [#allocation4]  }
   0xe   :  { %s39_s9 = sshll.u32 %s511_s8, 4  ;;  %s40_s9 = int_to_ptr.vmem [resolvable:$true] %s39_s9 }
   0xf   :  { %s492_s10 = scalar_lea.vmem %s40_s9, 1024  ;;  %p497_p6 = scmp.lt.s32.totalorder %s40_s9, %s40_s9 }
  0x10   :  { %p493_p5 = scmp.ne.s32.totalorder %s40_s9, %s492_s10  ;;  %p498_p7 = scmp.lt.s32.totalorder %s492_s10, %s492_s10 }
  0x12   :  { %p499_p8 = por %p498_p7, %p497_p6 }
  0x14   :  { %p500_p9 = pnand %p499_p8, %p493_p5 }
  0x16   :  { %503 = shalt.err (!%p500_p9)
}
  0x17   :  { %45 = dma.hbm_to_vmem [thread:$0]  %s612_s5, 1024, %s40_s9, [#allocation5], %s509_s27, %s509_s27, %s510_s28  }
  0x18   :  { %504 = dma.done.wait [#allocation3], 1024  }
  0x19   :  { %505 = vsyncadd [#allocation3], 4294966272 }
  0x1a   :  { %506 = dma.done.wait [#allocation5], 1024  }
  0x1b   :  { %507 = vsyncadd [#allocation5], 4294966272  ;;  %v512_v0 = vmov 0.0   ;;  %vm513_vm0 = vmmov 0   ;;  %vm70_vm1 = vcmask 1043456   ;;  %v55_v2 = vld [vmem:[%s607_s0] sm:$0xff] }
  0x1c   :  { %396 = vmatprep.subr.bf16.mxu0 %v512_v0  ;;  %398 = vmatprep.mubr.msk.bf16.mxu0 %vm513_vm0, %v512_v0  ;;  %v58_v1 = vld [vmem:[%s608_s1] sm:$0xf]  ;;  %v56_v3 = vld [vmem:[%s607_s0 + $0x8] sm:$0xff]  ;;  %v448_v6 = vld [vmem:[#allocation2 + $0x38] sm:$0xff]   ;;  %vm66_vm2 = vcmask 64512   ;;  %vm347_vm3 = vcmask 31744  }
  0x1d   :  { %402 = vmatprep.subr.bf16.mxu1 %v512_v0  ;;  %418 = vmatprep.mubr.msk.bf16.mxu1 %vm513_vm0, %v512_v0  ;;  %v72_v4 = vsel %vm70_vm1, %v58_v1, 0  ;;  %v57_v5 = vpack.c.bf16 %v56_v3, %v55_v2  ;;  %v449_v7 = vld [vmem:[#allocation2 + $0x30] sm:$0xff]   ;;  %v450_v8 = vld [vmem:[#allocation2 + $0x28] sm:$0xff]   ;;  %v451_v9 = vld [vmem:[#allocation2 + $0x20] sm:$0xff]  }
  0x1e   :  { %397 = vmatpush3.bf16.msra.mxu0 %v72_v4  ;;  %403 = vmatpush3.bf16.msra.mxu1 %v448_v6  ;;  %v452_v10 = vld [vmem:[#allocation2 + $0x18] sm:$0xff]   ;;  %v453_v11 = vld [vmem:[#allocation2 + $0x10] sm:$0xff]   ;;  %v454_v12 = vld [vmem:[#allocation2 + $0x8] sm:$0xff]  }
  0x1f   :  { %422 = vmatprep.subr.bf16.mxu0 %v512_v0  ;;  %404 = vmatprep.subr.bf16.mxu1 %v512_v0  ;;  %v455_v13 = vld [vmem:[#allocation2] sm:$0xff]   ;;  %v456_v14 = vld [vmem:[#allocation4 + $0x38] sm:$0xff]   ;;  %v457_v15 = vld [vmem:[#allocation4 + $0x30] sm:$0xff]  }
  0x20   :  { %v458_v16 = vld [vmem:[#allocation4 + $0x28] sm:$0xff]   ;;  %v459_v17 = vld [vmem:[#allocation4 + $0x20] sm:$0xff]   ;;  %v460_v18 = vld [vmem:[#allocation4 + $0x18] sm:$0xff]  }
  0x21   :  { %399 = vmatmul.mubr.msk.bf16.vlgmr.msra.gmra.mxu0 %vm66_vm2, %v57_v5  ;;  %v356_v19 = vld [vmem:[%s609_s2] ss:$0 sm:$0xff]  ;;  %v461_v29 = vld [vmem:[#allocation4 + $0x10] sm:$0xff]   ;;  %v462_v30 = vld [vmem:[#allocation4 + $0x8] sm:$0xff]  }
  0x22   :  { %438 = vmatprep.mubr.msk.bf16.mxu0 %vm513_vm0, %v512_v0  ;;  %405 = vmatpush3.bf16.msra.mxu1 %v449_v7  ;;  %v463_v31 = vld [vmem:[#allocation4] sm:$0xff]  }
  0x23   :  { %406 = vmatprep.subr.bf16.mxu1 %v512_v0  ;;  %423 = vmatpush3.bf16.msra.mxu0 %v456_v14  ;;  %v358_v32 = vld [vmem:[%s611_s4] ss:$0 sm:$0xff] }
  0x24   :  { %424 = vmatprep.subr.bf16.mxu0 %v512_v0  ;;  %v375_v42 = vld [vmem:[%s613_s6] ss:$0 sm:$0xff] }
  0x26   :  { %407 = vmatpush3.bf16.msra.mxu1 %v450_v8 }
  0x27   :  { %408 = vmatprep.subr.bf16.mxu1 %v512_v0  ;;  %425 = vmatpush3.bf16.msra.mxu0 %v457_v15 }
  0x28   :  { %426 = vmatprep.subr.bf16.mxu0 %v512_v0 }
  0x2a   :  { %409 = vmatpush3.bf16.msra.mxu1 %v451_v9 }
  0x2b   :  { %410 = vmatprep.subr.bf16.mxu1 %v512_v0  ;;  %427 = vmatpush3.bf16.msra.mxu0 %v458_v16 }
  0x2c   :  { %428 = vmatprep.subr.bf16.mxu0 %v512_v0 }
  0x2e   :  { %411 = vmatpush3.bf16.msra.mxu1 %v452_v10 }
  0x2f   :  { %412 = vmatprep.subr.bf16.mxu1 %v512_v0  ;;  %429 = vmatpush3.bf16.msra.mxu0 %v459_v17 }
  0x30   :  { %430 = vmatprep.subr.bf16.mxu0 %v512_v0 }
  0x32   :  { %413 = vmatpush3.bf16.msra.mxu1 %v453_v11 }
  0x33   :  { %414 = vmatprep.subr.bf16.mxu1 %v512_v0  ;;  %431 = vmatpush3.bf16.msra.mxu0 %v460_v18 }
  0x34   :  { %432 = vmatprep.subr.bf16.mxu0 %v512_v0 }
  0x36   :  { %415 = vmatpush3.bf16.msra.mxu1 %v454_v12 }
  0x37   :  { %416 = vmatprep.subr.bf16.mxu1 %v512_v0  ;;  %433 = vmatpush3.bf16.msra.mxu0 %v461_v29 }
  0x38   :  { %434 = vmatprep.subr.bf16.mxu0 %v512_v0 }
  0x3a   :  { %417 = vmatpush3.bf16.msra.mxu1 %v455_v13 }
  0x3b   :  { %435 = vmatpush3.bf16.msra.mxu0 %v462_v30 }
  0x3c   :  { %436 = vmatprep.subr.bf16.mxu0 %v512_v0 }
  0x3f   :  { %437 = vmatpush3.bf16.msra.mxu0 %v463_v31 }
  0xe1   :  { %v108_v20 = vpop.f32.mrf.mxu0 }
  0xe2   :  { %v109_v22 = vadd.f32 %v356_v19, %v108_v20 }
  0xe3   :  { %v400_v21 = vpop.f32.mrf.mxu0 }
  0xe4   :  { %v115_v26 = vmax.f32 %v109_v22, 0.0 }
  0xe5   :  { %v111_v23 = vpop.f32.mrf.mxu0 }
  0xe6   :  { %v112_v24 = vadd.f32 %v356_v19, %v111_v23 }
  0xe7   :  { %v401_v25 = vpop.f32.mrf.mxu0 }
  0xe8   :  { %v116_v27 = vmax.f32 %v112_v24, 0.0 }
  0xea   :  { %v117_v28 = vpack.c.bf16 %v116_v27, %v115_v26 }
  0xec   :  { %419 = vmatmul.mubr.bf16.vlgmr.msra.gmra.mxu1 %v117_v28 }
 0x1ac   :  { %v223_v33 = vpop.f32.mrf.mxu1 }
 0x1ad   :  { %v224_v35 = vadd.f32 %v358_v32, %v223_v33 }
 0x1ae   :  { %v420_v34 = vpop.f32.mrf.mxu1 }
 0x1af   :  { %v230_v39 = vmax.f32 %v224_v35, 0.0 }
 0x1b0   :  { %v226_v36 = vpop.f32.mrf.mxu1 }
 0x1b1   :  { %v227_v37 = vadd.f32 %v358_v32, %v226_v36 }
 0x1b2   :  { %v421_v38 = vpop.f32.mrf.mxu1 }
 0x1b3   :  { %v231_v40 = vmax.f32 %v227_v37, 0.0 }
 0x1b5   :  { %v232_v41 = vpack.c.bf16 %v231_v40, %v230_v39 }
 0x1b7   :  { %439 = vmatmul.mubr.bf16.vlgmr.msra.gmra.mxu0 %v232_v41 }
 0x277   :  { %v331_v43 = vpop.f32.mrf.mxu0 }
 0x278   :  { %v345_v44 = vadd.f32 %v375_v42, %v331_v43 }
 0x279   :  { %v440_v45 = vpop.f32.mrf.mxu0 }
 0x27a   :  { %348 = vst.msk [vmem:[%s614_s7] sm:$0xff] %vm347_vm3, %v345_v44 }
 0x27b   :  { %v334_v46 = vpop.f32.mrf.mxu0 }
 0x27c   :  { %v346_v47 = vadd.f32 %v375_v42, %v334_v46 }
 0x27d   :  { %v441_v48 = vpop.f32.mrf.mxu0 }
 0x27e   :  { %349 = vst.msk [vmem:[%s614_s7 + $0x8] sm:$0xff] %vm347_vm3, %v346_v47 }
 0x27f   :  { %354 = vsyncpa [#allocation3], 1 }
 0x280   :  { %355 = vsyncpa [#allocation5], 1 }

</bundles_post_ra>
